<compile_context>
chip_gen: v7x
topology: tpu7x:2x2x1
jax: 0.10.0
libtpu: 0.0.40
codegen_flags: <defaults>
</compile_context>

<pallas_src>
import jax
import jax.numpy as jnp
from jax.experimental import pallas as pl
from jax.experimental.pallas import tpu as pltpu


def _round_up(x, m):
    return (x + m - 1) // m * m


# --------------------------------------------------------------------------------------
# Pallas kernel: fused  y = relu(x @ W1 + b1) @ W2 + b2
# --------------------------------------------------------------------------------------
def _mlp_kernel(x_ref, w1_ref, b1_ref, w2_ref, b2_ref, o_ref):
    # Layer 1: bf16 operands on the MXU, f32 accumulation, fused bias + ReLU in f32.
    h = jnp.dot(x_ref[...], w1_ref[...], preferred_element_type=jnp.float32)
    h = jnp.maximum(h + b1_ref[...], 0.0)
    # Layer 2: cast the hidden activation to bf16 for the MXU, accumulate in f32, fused bias.
    out = jnp.dot(h.astype(w2_ref.dtype), w2_ref[...], preferred_element_type=jnp.float32)
    o_ref[...] = (out + b2_ref[...]).astype(o_ref.dtype)


def mlp_forward(x, params, *, tm=256):
    """x: (M, in_features) -> logits (M, n_classes). Matches LargerModel.forward."""
    w1, b1 = params["fc1"]            # (K1, H), (H,)
    w2, b2 = params["fc2"]            # (H, N2), (N2,)

    x = x.astype(jnp.float32)         # matches x.to(torch.float32)
    M, K1 = x.shape
    H = w1.shape[1]
    N2 = w2.shape[1]

    # Tile / padding choices.  K1 (=512) and H (=256) are already lane-aligned so only the
    # batch (sublane) and n_classes (lane) dims need padding.  tm adapts to the real batch.
    tm = min(tm, _round_up(M, 8))
    Mp = _round_up(M, tm)
    N2p = _round_up(max(N2, 128), 128)

    # bf16 MXU operands; biases stay f32 for the VPU epilogue.
    xp = jnp.zeros((Mp, K1), jnp.bfloat16).at[:M, :].set(x.astype(jnp.bfloat16))
    w1b = w1.astype(jnp.bfloat16)
    w2b = jnp.zeros((H, N2p), jnp.bfloat16).at[:, :N2].set(w2.astype(jnp.bfloat16))
    b1r = b1.reshape(1, H).astype(jnp.float32)
    b2r = jnp.zeros((1, N2p), jnp.float32).at[0, :N2].set(b2.astype(jnp.float32))

    # VMEM footprint per grid step (tm=256): x 256x512 bf16 (256 KiB) + W1 512x256 bf16
    # (256 KiB) + W2 256x128 bf16 (64 KiB) + out 256x128 f32 (128 KiB) — trivially fits
    # even v7x's 64 MiB VMEM with double buffering, so no vmem_limit override is needed.
    out = pl.pallas_call(
        _mlp_kernel,
        out_shape=jax.ShapeDtypeStruct((Mp, N2p), jnp.float32),
        grid_spec=pltpu.PrefetchScalarGridSpec(
            num_scalar_prefetch=0,
            grid=(Mp // tm,),
            in_specs=[
                pl.BlockSpec((tm, K1), lambda i: (i, 0)),
                pl.BlockSpec((K1, H), lambda i: (0, 0)),
                pl.BlockSpec((1, H), lambda i: (0, 0)),
                pl.BlockSpec((H, N2p), lambda i: (0, 0)),
                pl.BlockSpec((1, N2p), lambda i: (0, 0)),
            ],
            out_specs=pl.BlockSpec((tm, N2p), lambda i: (i, 0)),
        ),
        compiler_params=pltpu.CompilerParams(
            dimension_semantics=("parallel",)),
    )(xp, w1b, b1r, w2b, b2r)
    return out[:M, :N2]


# --------------------------------------------------------------------------------------
# Deterministic synthetic parameters (PyTorch nn.Linear default init semantics)
# --------------------------------------------------------------------------------------
def init_params(key, n_classes, in_features=512):
    hidden = in_features // 2
    k1, k2, k3, k4 = jax.random.split(key, 4)
    bound1 = float(in_features) ** -0.5
    w1 = jax.random.uniform(k1, (in_features, hidden), jnp.float32, -bound1, bound1)
    b1 = jax.random.uniform(k2, (hidden,), jnp.float32, -bound1, bound1)
    bound2 = float(hidden) ** -0.5
    w2 = jax.random.uniform(k3, (hidden, n_classes), jnp.float32, -bound2, bound2)
    b2 = jax.random.uniform(k4, (n_classes,), jnp.float32, -bound2, bound2)
    return {"fc1": (w1, b1), "fc2": (w2, b2)}


def mlp_reference(x, params):
    w1, b1 = params["fc1"]
    w2, b2 = params["fc2"]
    h = jnp.maximum(x.astype(jnp.float32) @ w1 + b1, 0.0)
    return h @ w2 + b2


if __name__ == "__main__":
    key = jax.random.PRNGKey(0)
    pkey, xkey = jax.random.split(key)

    n_classes = 10
    in_features = 512          # module default
    batch = 2

    params = init_params(pkey, n_classes, in_features)
    x = jax.random.normal(xkey, (batch, in_features), jnp.float32)

    fwd = jax.jit(mlp_forward)
    logits = fwd(x, params)
    jax.block_until_ready(logits)

    assert logits.shape == (batch, n_classes), logits.shape
    assert bool(jnp.all(jnp.isfinite(logits)))

    # Loose tolerance: bf16 MXU operands (f32 accumulation) vs. the f32 JAX reference.
    ref = mlp_reference(x, params)
    assert bool(jnp.allclose(logits, ref, rtol=5e-2, atol=5e-2)), \
        (jnp.max(jnp.abs(logits - ref)))

    print("KERNEL_OK")
</pallas_src>

<mosaic_0001>
module attributes {stable_mosaic.version = 11 : i64} {
  func.func @_mlp_kernel(%arg0: i32, %arg1: memref<8x512xbf16, #tpu.memory_space<vmem>>, %arg2: memref<512x256xbf16, #tpu.memory_space<vmem>>, %arg3: memref<1x256xf32, #tpu.memory_space<vmem>>, %arg4: memref<256x128xbf16, #tpu.memory_space<vmem>>, %arg5: memref<1x128xf32, #tpu.memory_space<vmem>>, %arg6: memref<8x128xf32, #tpu.memory_space<vmem>>) attributes {dimension_semantics = [#tpu.dimension_semantics<parallel>], iteration_bounds = array<i64: 1>, scalar_prefetch = 0 : i64, scratch_operands = 0 : i64, tpu.core_type = #tpu.core_type<tc>, window_params = [{transform_indices = @transform_0, window_bounds = array<i64: 8, 512>}, {pipeline_mode = #tpu.pipeline_mode<synchronous>, transform_indices = @transform_1, window_bounds = array<i64: 512, 256>}, {pipeline_mode = #tpu.pipeline_mode<synchronous>, transform_indices = @transform_2, window_bounds = array<i64: 1, 256>}, {pipeline_mode = #tpu.pipeline_mode<synchronous>, transform_indices = @transform_3, window_bounds = array<i64: 256, 128>}, {pipeline_mode = #tpu.pipeline_mode<synchronous>, transform_indices = @transform_4, window_bounds = array<i64: 1, 128>}, {transform_indices = @transform_5, window_bounds = array<i64: 8, 128>}]} {
    %c0 = arith.constant 0 : index
    %c0_0 = arith.constant 0 : index
    %0 = vector.load %arg1[%c0, %c0_0] : memref<8x512xbf16, #tpu.memory_space<vmem>>, vector<8x512xbf16>
    %c0_1 = arith.constant 0 : index
    %c0_2 = arith.constant 0 : index
    %1 = vector.load %arg2[%c0_1, %c0_2] : memref<512x256xbf16, #tpu.memory_space<vmem>>, vector<512x256xbf16>
    %cst = arith.constant dense<0.000000e+00> : vector<8x256xf32>
    %2 = tpu.matmul %0, %1, %cst {dimension_numbers = #tpu.dot_dimension_numbers<[1], [0], [0], [1], [0, 0, 1, 1], [], []>} : vector<8x512xbf16>, vector<512x256xbf16>, vector<8x256xf32> -> vector<8x256xf32>
    %c0_3 = arith.constant 0 : index
    %c0_4 = arith.constant 0 : index
    %3 = vector.load %arg3[%c0_3, %c0_4] : memref<1x256xf32, #tpu.memory_space<vmem>>, vector<1x256xf32>
    %4 = vector.broadcast %3 : vector<1x256xf32> to vector<8x256xf32>
    %5 = arith.addf %2, %4 : vector<8x256xf32>
    %cst_5 = arith.constant 0.000000e+00 : f32
    %6 = vector.broadcast %cst_5 : f32 to vector<8x256xf32>
    %7 = arith.maximumf %5, %6 : vector<8x256xf32>
    %8 = arith.truncf %7 : vector<8x256xf32> to vector<8x256xbf16>
    %c0_6 = arith.constant 0 : index
    %c0_7 = arith.constant 0 : index
    %9 = vector.load %arg4[%c0_6, %c0_7] : memref<256x128xbf16, #tpu.memory_space<vmem>>, vector<256x128xbf16>
    %cst_8 = arith.constant dense<0.000000e+00> : vector<8x128xf32>
    %10 = tpu.matmul %8, %9, %cst_8 {dimension_numbers = #tpu.dot_dimension_numbers<[1], [0], [0], [1], [0, 0, 1, 1], [], []>} : vector<8x256xbf16>, vector<256x128xbf16>, vector<8x128xf32> -> vector<8x128xf32>
    %c0_9 = arith.constant 0 : index
    %c0_10 = arith.constant 0 : index
    %11 = vector.load %arg5[%c0_9, %c0_10] : memref<1x128xf32, #tpu.memory_space<vmem>>, vector<1x128xf32>
    %12 = vector.broadcast %11 : vector<1x128xf32> to vector<8x128xf32>
    %13 = arith.addf %10, %12 : vector<8x128xf32>
    %c0_11 = arith.constant 0 : index
    %c0_12 = arith.constant 0 : index
    %14 = vector.load %arg6[%c0_11, %c0_12] : memref<8x128xf32, #tpu.memory_space<vmem>>, vector<8x128xf32>
    tpu.vector_store %arg6[%c0_11, %c0_12], %13 {strides = array<i32>} : memref<8x128xf32, #tpu.memory_space<vmem>>, vector<8x128xf32>,
    return
  }
  func.func @transform_0(%arg0: i32) -> (i32, i32) {
    %c0_i32 = arith.constant 0 : i32
    %c0_i32_0 = arith.constant 0 : i32
    return %arg0, %c0_i32 : i32, i32
  }
  func.func @transform_1(%arg0: i32) -> (i32, i32) {
    %c0_i32 = arith.constant 0 : i32
    %c0_i32_0 = arith.constant 0 : i32
    %c0_i32_1 = arith.constant 0 : i32
    return %c0_i32, %c0_i32_0 : i32, i32
  }
  func.func @transform_2(%arg0: i32) -> (i32, i32) {
    %c0_i32 = arith.constant 0 : i32
    %c0_i32_0 = arith.constant 0 : i32
    %c0_i32_1 = arith.constant 0 : i32
    return %c0_i32, %c0_i32_0 : i32, i32
  }
  func.func @transform_3(%arg0: i32) -> (i32, i32) {
    %c0_i32 = arith.constant 0 : i32
    %c0_i32_0 = arith.constant 0 : i32
    %c0_i32_1 = arith.constant 0 : i32
    return %c0_i32, %c0_i32_0 : i32, i32
  }
  func.func @transform_4(%arg0: i32) -> (i32, i32) {
    %c0_i32 = arith.constant 0 : i32
    %c0_i32_0 = arith.constant 0 : i32
    %c0_i32_1 = arith.constant 0 : i32
    return %c0_i32, %c0_i32_0 : i32, i32
  }
  func.func @transform_5(%arg0: i32) -> (i32, i32) {
    %c0_i32 = arith.constant 0 : i32
    %c0_i32_0 = arith.constant 0 : i32
    return %arg0, %c0_i32 : i32, i32
  }
}

</mosaic_0001>

<bundles_post_ra>
// kernel: mlp_forward.1
= control target key start
LH: loop header
LB: loop body
LE: loop exit
PB: predicated region body
PF: predicated region fallthrough
CT: control target
= control target key end

     0   :  { %s1211_s1 = inlined_call_operand.vmem [shape: bf16[512,256], index: 1, kind: input, shape index: {}]   ;;  %s1212_s0 = inlined_call_operand.vmem [shape: bf16[8,512], index: 0, kind: input, shape index: {}]   ;;  %s1213_s3 = inlined_call_operand.vmem [shape: bf16[256,128], index: 3, kind: input, shape index: {}]   ;;  %s1214_s2 = inlined_call_operand.vmem [shape: f32[1,256], index: 2, kind: input, shape index: {}]   ;;  %s1215_s4 = inlined_call_operand.vmem [shape: f32[1,128], index: 4, kind: input, shape index: {}]   ;;  %s1216_s5 = inlined_call_operand.vmem [shape: f32[8,128], index: 5, kind: output, shape index: {}]  }
   0x1   :  { %v810_v0 = vld [vmem:[%s1211_s1 + $0x4] ss:$8 sps:$4 sm:$0xff]   ;;  %v814_v2 = vld [vmem:[%s1211_s1] ss:$8 sps:$4 sm:$0xff]   ;;  %v816_v4 = vld [vmem:[%s1211_s1 + $0x14] ss:$8 sps:$4 sm:$0xff]  }
   0x2   :  { %v812_v1 = vld [vmem:[%s1211_s1 + $0x104] ss:$8 sps:$4 sm:$0xff]   ;;  %433 = vmatprep.subr.bf16.mxu1 %v810_v0  ;;  %v815_v3 = vld [vmem:[%s1211_s1 + $0x100] ss:$8 sps:$4 sm:$0xff]   ;;  %v818_v5 = vld [vmem:[%s1211_s1 + $0x114] ss:$8 sps:$4 sm:$0xff]  }
   0x3   :  { %474 = vmatprep.subr.bf16.mxu0 %v812_v1  ;;  %434 = vmatpush1.bf16.msra.mxu1 %v814_v2  ;;  %v820_v6 = vld [vmem:[%s1211_s1 + $0x10] ss:$8 sps:$4 sm:$0xff]   ;;  %v822_v8 = vld [vmem:[%s1211_s1 + $0x24] ss:$8 sps:$4 sm:$0xff]   ;;  %v826_v10 = vld [vmem:[%s1211_s1 + $0x20] ss:$8 sps:$4 sm:$0xff]  }
   0x4   :  { %475 = vmatpush1.bf16.msra.mxu0 %v815_v3  ;;  %435 = vmatprep.subr.bf16.mxu1 %v816_v4  ;;  %v821_v7 = vld [vmem:[%s1211_s1 + $0x110] ss:$8 sps:$4 sm:$0xff]   ;;  %v824_v9 = vld [vmem:[%s1211_s1 + $0x124] ss:$8 sps:$4 sm:$0xff]   ;;  %v827_v11 = vld [vmem:[%s1211_s1 + $0x120] ss:$8 sps:$4 sm:$0xff]  }
   0x5   :  { %476 = vmatprep.subr.bf16.mxu0 %v818_v5  ;;  %v828_v12 = vld [vmem:[%s1211_s1 + $0x34] ss:$8 sps:$4 sm:$0xff]   ;;  %v832_v14 = vld [vmem:[%s1211_s1 + $0x30] ss:$8 sps:$4 sm:$0xff]   ;;  %v834_v16 = vld [vmem:[%s1211_s1 + $0x44] ss:$8 sps:$4 sm:$0xff]  }
   0x6   :  { %v830_v13 = vld [vmem:[%s1211_s1 + $0x134] ss:$8 sps:$4 sm:$0xff]   ;;  %v833_v15 = vld [vmem:[%s1211_s1 + $0x130] ss:$8 sps:$4 sm:$0xff]   ;;  %v836_v17 = vld [vmem:[%s1211_s1 + $0x144] ss:$8 sps:$4 sm:$0xff]  }
   0x7   :  { %436 = vmatpush1.bf16.msra.mxu1 %v820_v6  ;;  %v838_v18 = vld [vmem:[%s1211_s1 + $0x40] ss:$8 sps:$4 sm:$0xff]   ;;  %v840_v20 = vld [vmem:[%s1211_s1 + $0x54] ss:$8 sps:$4 sm:$0xff]   ;;  %v844_v22 = vld [vmem:[%s1211_s1 + $0x50] ss:$8 sps:$4 sm:$0xff]  }
   0x8   :  { %477 = vmatpush1.bf16.msra.mxu0 %v821_v7  ;;  %437 = vmatprep.subr.bf16.mxu1 %v822_v8  ;;  %v839_v19 = vld [vmem:[%s1211_s1 + $0x140] ss:$8 sps:$4 sm:$0xff]   ;;  %v842_v21 = vld [vmem:[%s1211_s1 + $0x154] ss:$8 sps:$4 sm:$0xff]   ;;  %v845_v23 = vld [vmem:[%s1211_s1 + $0x150] ss:$8 sps:$4 sm:$0xff]  }
   0x9   :  { %478 = vmatprep.subr.bf16.mxu0 %v824_v9  ;;  %v846_v24 = vld [vmem:[%s1211_s1 + $0x64] ss:$8 sps:$4 sm:$0xff]   ;;  %v850_v26 = vld [vmem:[%s1211_s1 + $0x60] ss:$8 sps:$4 sm:$0xff]   ;;  %v852_v28 = vld [vmem:[%s1211_s1 + $0x74] ss:$8 sps:$4 sm:$0xff]  }
   0xa   :  { %v848_v25 = vld [vmem:[%s1211_s1 + $0x164] ss:$8 sps:$4 sm:$0xff]   ;;  %v851_v27 = vld [vmem:[%s1211_s1 + $0x160] ss:$8 sps:$4 sm:$0xff]   ;;  %v854_v29 = vld [vmem:[%s1211_s1 + $0x174] ss:$8 sps:$4 sm:$0xff]  }
   0xb   :  { %438 = vmatpush1.bf16.msra.mxu1 %v826_v10  ;;  %v856_v30 = vld [vmem:[%s1211_s1 + $0x70] ss:$8 sps:$4 sm:$0xff]   ;;  %v858_v32 = vld [vmem:[%s1211_s1 + $0x84] ss:$8 sps:$4 sm:$0xff]   ;;  %v862_v34 = vld [vmem:[%s1211_s1 + $0x80] ss:$8 sps:$4 sm:$0xff]  }
   0xc   :  { %479 = vmatpush1.bf16.msra.mxu0 %v827_v11  ;;  %439 = vmatprep.subr.bf16.mxu1 %v828_v12  ;;  %v857_v31 = vld [vmem:[%s1211_s1 + $0x170] ss:$8 sps:$4 sm:$0xff]   ;;  %v860_v33 = vld [vmem:[%s1211_s1 + $0x184] ss:$8 sps:$4 sm:$0xff]   ;;  %v863_v35 = vld [vmem:[%s1211_s1 + $0x180] ss:$8 sps:$4 sm:$0xff]  }
   0xd   :  { %480 = vmatprep.subr.bf16.mxu0 %v830_v13  ;;  %v864_v36 = vld [vmem:[%s1211_s1 + $0x94] ss:$8 sps:$4 sm:$0xff]   ;;  %v868_v38 = vld [vmem:[%s1211_s1 + $0x90] ss:$8 sps:$4 sm:$0xff]   ;;  %v870_v40 = vld [vmem:[%s1211_s1 + $0xa4] ss:$8 sps:$4 sm:$0xff]  }
   0xe   :  { %v866_v37 = vld [vmem:[%s1211_s1 + $0x194] ss:$8 sps:$4 sm:$0xff]   ;;  %v869_v39 = vld [vmem:[%s1211_s1 + $0x190] ss:$8 sps:$4 sm:$0xff]   ;;  %v872_v41 = vld [vmem:[%s1211_s1 + $0x1a4] ss:$8 sps:$4 sm:$0xff]  }
   0xf   :  { %440 = vmatpush1.bf16.msra.mxu1 %v832_v14  ;;  %v874_v42 = vld [vmem:[%s1211_s1 + $0xa0] ss:$8 sps:$4 sm:$0xff]   ;;  %v876_v44 = vld [vmem:[%s1211_s1 + $0xb4] ss:$8 sps:$4 sm:$0xff]   ;;  %v880_v46 = vld [vmem:[%s1211_s1 + $0xb0] ss:$8 sps:$4 sm:$0xff]  }
  0x10   :  { %481 = vmatpush1.bf16.msra.mxu0 %v833_v15  ;;  %441 = vmatprep.subr.bf16.mxu1 %v834_v16  ;;  %v875_v43 = vld [vmem:[%s1211_s1 + $0x1a0] ss:$8 sps:$4 sm:$0xff]   ;;  %v878_v45 = vld [vmem:[%s1211_s1 + $0x1b4] ss:$8 sps:$4 sm:$0xff]   ;;  %v881_v47 = vld [vmem:[%s1211_s1 + $0x1b0] ss:$8 sps:$4 sm:$0xff]  }
  0x11   :  { %482 = vmatprep.subr.bf16.mxu0 %v836_v17  ;;  %v21_v48 = vld [vmem:[%s1212_s0] sm:$0xff]  ;;  %v22_v50 = vld [vmem:[%s1212_s0 + $0x8] sm:$0xff]  ;;  %v888_v56 = vld [vmem:[%s1211_s1 + $0xd4] ss:$8 sps:$4 sm:$0xff]  }
  0x12   :  { %v700_v49 = vcombine.high %v21_v48, %v21_v48  ;;  %v882_v51 = vld [vmem:[%s1211_s1 + $0xc4] ss:$8 sps:$4 sm:$0xff]   ;;  %v702_v52 = vcombine.high %v22_v50, %v22_v50  ;;  %v886_v54 = vld [vmem:[%s1211_s1 + $0xc0] ss:$8 sps:$4 sm:$0xff]   ;;  %v890_v57 = vld [vmem:[%s1211_s1 + $0x1d4] ss:$8 sps:$4 sm:$0xff]   ;;  %v699_v5 = vcombine.low %v21_v48, %v21_v48  ;;  %v701_v6 = vcombine.low %v22_v50, %v22_v50 }
  0x13   :  { %442 = vmatpush1.bf16.msra.mxu1 %v838_v18  ;;  %v884_v53 = vld [vmem:[%s1211_s1 + $0x1c4] ss:$8 sps:$4 sm:$0xff]   ;;  %v887_v55 = vld [vmem:[%s1211_s1 + $0x1c0] ss:$8 sps:$4 sm:$0xff]   ;;  %v892_v58 = vld [vmem:[%s1211_s1 + $0xd0] ss:$8 sps:$4 sm:$0xff]  }
  0x14   :  { %483 = vmatpush1.bf16.msra.mxu0 %v839_v19  ;;  %443 = vmatprep.subr.bf16.mxu1 %v840_v20  ;;  %v893_v59 = vld [vmem:[%s1211_s1 + $0x1d0] ss:$8 sps:$4 sm:$0xff]   ;;  %v894_v60 = vld [vmem:[%s1211_s1 + $0xe4] ss:$8 sps:$4 sm:$0xff]   ;;  %v898_v62 = vld [vmem:[%s1211_s1 + $0xe0] ss:$8 sps:$4 sm:$0xff]  }
  0x15   :  { %484 = vmatprep.subr.bf16.mxu0 %v842_v21  ;;  %465 = vmatprep.mubr.bf16.mxu1 %v700_v49  ;;  %v896_v61 = vld [vmem:[%s1211_s1 + $0x1e4] ss:$8 sps:$4 sm:$0xff]   ;;  %v899_v63 = vld [vmem:[%s1211_s1 + $0x1e0] ss:$8 sps:$4 sm:$0xff]   ;;  %v900_v0 = vld [vmem:[%s1211_s1 + $0xf4] ss:$8 sps:$4 sm:$0xff]  }
  0x16   :  { %506 = vmatprep.mubr.bf16.mxu0 %v702_v52  ;;  %v902_v1 = vld [vmem:[%s1211_s1 + $0x1f4] ss:$8 sps:$4 sm:$0xff]   ;;  %v904_v2 = vld [vmem:[%s1211_s1 + $0xf0] ss:$8 sps:$4 sm:$0xff]   ;;  %v910_v4 = vld [vmem:[%s1213_s3 + $0x40] sm:$0xff]  }
  0x17   :  { %444 = vmatpush1.bf16.msra.mxu1 %v844_v22  ;;  %v905_v3 = vld [vmem:[%s1211_s1 + $0x1f0] ss:$8 sps:$4 sm:$0xff]   ;;  %v911_v7 = vld [vmem:[%s1213_s3] sm:$0xff]   ;;  %v912_v8 = vld [vmem:[%s1213_s3 + $0x48] sm:$0xff]   ;;  %v89_v22 = vlaneseq }
  0x18   :  { %485 = vmatpush1.bf16.msra.mxu0 %v845_v23  ;;  %445 = vmatprep.subr.bf16.mxu1 %v846_v24  ;;  %v913_v9 = vld [vmem:[%s1213_s3 + $0x8] sm:$0xff]   ;;  %v914_v10 = vld [vmem:[%s1213_s3 + $0x50] sm:$0xff]   ;;  %v916_v12 = vld [vmem:[%s1213_s3 + $0x58] sm:$0xff]  }
  0x19   :  { %486 = vmatprep.subr.bf16.mxu0 %v848_v25  ;;  %v915_v11 = vld [vmem:[%s1213_s3 + $0x10] sm:$0xff]   ;;  %v917_v13 = vld [vmem:[%s1213_s3 + $0x18] sm:$0xff]   ;;  %v918_v14 = vld [vmem:[%s1213_s3 + $0x60] sm:$0xff]   ;;  %v90_v23 = vshrl.u32 %v89_v22, 7 }
  0x1a   :  { %v919_v15 = vld [vmem:[%s1213_s3 + $0x20] sm:$0xff]   ;;  %v920_v16 = vld [vmem:[%s1213_s3 + $0x68] sm:$0xff]   ;;  %v922_v18 = vld [vmem:[%s1213_s3 + $0x70] sm:$0xff]  }
  0x1b   :  { %446 = vmatpush1.bf16.msra.mxu1 %v850_v26  ;;  %v921_v17 = vld [vmem:[%s1213_s3 + $0x28] sm:$0xff]   ;;  %v923_v19 = vld [vmem:[%s1213_s3 + $0x30] sm:$0xff]   ;;  %v924_v20 = vld [vmem:[%s1213_s3 + $0x78] sm:$0xff]   ;;  %v91_v24 = vsub.s32 0, %v90_v23  ;;  %v95_v26 = vsub.s32 1, %v90_v23 }
  0x1c   :  { %487 = vmatpush1.bf16.msra.mxu0 %v851_v27  ;;  %447 = vmatprep.subr.bf16.mxu1 %v852_v28  ;;  %v925_v21 = vld [vmem:[%s1213_s3 + $0x38] sm:$0xff]   ;;  %v87_v25 = vld [vmem:[%s1214_s2] sm:$0x3] }
  0x1d   :  { %488 = vmatprep.subr.bf16.mxu0 %v854_v29  ;;  %v92_v27 = vrot.slane %v87_v25, %v91_v24  ;;  %v96_v28 = vrot.slane %v87_v25, %v95_v26 }
  0x1f   :  { %448 = vmatpush1.bf16.msra.mxu1 %v856_v30 }
  0x20   :  { %489 = vmatpush1.bf16.msra.mxu0 %v857_v31  ;;  %449 = vmatprep.subr.bf16.mxu1 %v858_v32 }
  0x21   :  { %490 = vmatprep.subr.bf16.mxu0 %v860_v33 }
  0x23   :  { %450 = vmatpush1.bf16.msra.mxu1 %v862_v34 }
  0x24   :  { %491 = vmatpush1.bf16.msra.mxu0 %v863_v35  ;;  %451 = vmatprep.subr.bf16.mxu1 %v864_v36 }
  0x25   :  { %492 = vmatprep.subr.bf16.mxu0 %v866_v37 }
  0x27   :  { %452 = vmatpush1.bf16.msra.mxu1 %v868_v38 }
  0x28   :  { %493 = vmatpush1.bf16.msra.mxu0 %v869_v39  ;;  %453 = vmatprep.subr.bf16.mxu1 %v870_v40 }
  0x29   :  { %494 = vmatprep.subr.bf16.mxu0 %v872_v41 }
  0x2b   :  { %454 = vmatpush1.bf16.msra.mxu1 %v874_v42 }
  0x2c   :  { %495 = vmatpush1.bf16.msra.mxu0 %v875_v43  ;;  %455 = vmatprep.subr.bf16.mxu1 %v876_v44 }
  0x2d   :  { %496 = vmatprep.subr.bf16.mxu0 %v878_v45 }
  0x2f   :  { %456 = vmatpush1.bf16.msra.mxu1 %v880_v46  ;;  %v767_v46 = vld [vmem:[%s1215_s4] ss:$0 sm:$0xff] }
  0x30   :  { %497 = vmatpush1.bf16.msra.mxu0 %v881_v47  ;;  %457 = vmatprep.subr.bf16.mxu1 %v882_v51 }
  0x31   :  { %498 = vmatprep.subr.bf16.mxu0 %v884_v53 }
  0x33   :  { %458 = vmatpush1.bf16.msra.mxu1 %v886_v54 }
  0x34   :  { %499 = vmatpush1.bf16.msra.mxu0 %v887_v55  ;;  %459 = vmatprep.subr.bf16.mxu1 %v888_v56 }
  0x35   :  { %500 = vmatprep.subr.bf16.mxu0 %v890_v57 }
  0x37   :  { %460 = vmatpush1.bf16.msra.mxu1 %v892_v58 }
  0x38   :  { %501 = vmatpush1.bf16.msra.mxu0 %v893_v59  ;;  %461 = vmatprep.subr.bf16.mxu1 %v894_v60 }
  0x39   :  { %502 = vmatprep.subr.bf16.mxu0 %v896_v61 }
  0x3b   :  { %462 = vmatpush1.bf16.msra.mxu1 %v898_v62 }
  0x3c   :  { %503 = vmatpush1.bf16.msra.mxu0 %v899_v63  ;;  %463 = vmatprep.subr.bf16.mxu1 %v900_v0 }
  0x3d   :  { %504 = vmatprep.subr.bf16.mxu0 %v902_v1 }
  0x3f   :  { %464 = vmatpush1.bf16.msra.mxu1 %v904_v2 }
  0x40   :  { %505 = vmatpush1.bf16.msra.mxu0 %v905_v3  ;;  %784 = vmatprep.subr.bf16.mxu1 %v910_v4 }
  0x42   :  { %466 = vmatmul.mubr.bf16.vlgmr.msra.gmra.mrb[0].mxu1 %v699_v5 }
  0x43   :  { %507 = vmatmul.mubr.bf16.vlgmr.msra.gmra.mrb[0].mxu0 %v701_v6  ;;  %785 = vmatpush3.bf16.msra.mxu1 %v911_v7 }
  0x44   :  { %786 = vmatprep.subr.bf16.mxu1 %v912_v8 }
  0x47   :  { %787 = vmatpush3.bf16.msra.mxu1 %v913_v9 }
  0x48   :  { %788 = vmatprep.subr.bf16.mxu1 %v914_v10 }
  0x4b   :  { %789 = vmatpush3.bf16.msra.mxu1 %v915_v11 }
  0x4c   :  { %790 = vmatprep.subr.bf16.mxu1 %v916_v12 }
  0x4f   :  { %791 = vmatpush3.bf16.msra.mxu1 %v917_v13 }
  0x50   :  { %792 = vmatprep.subr.bf16.mxu1 %v918_v14 }
  0x53   :  { %793 = vmatpush3.bf16.msra.mxu1 %v919_v15 }
  0x54   :  { %794 = vmatprep.subr.bf16.mxu1 %v920_v16 }
  0x57   :  { %795 = vmatpush3.bf16.msra.mxu1 %v921_v17 }
  0x58   :  { %796 = vmatprep.subr.bf16.mxu1 %v922_v18 }
  0x5b   :  { %797 = vmatpush3.bf16.msra.mxu1 %v923_v19 }
  0x5c   :  { %798 = vmatprep.subr.bf16.mxu1 %v924_v20 }
  0x5f   :  { %799 = vmatpush3.bf16.msra.mxu1 %v925_v21 }
 0x115   :  { %v467_v29 = vpop.f32.mrb[0].mxu1 }
 0x116   :  { %v508_v30 = vpop.f32.mrb[0].mxu0  ;;  %v468_v31 = vadd.f32 %v467_v29, %v92_v27  ;;  %v469_v32 = vpop.f32.mrb[1].mxu1 }
 0x117   :  { %v510_v33 = vpop.f32.mrb[1].mxu0  ;;  %v470_v34 = vadd.f32 %v469_v32, %v96_v28  ;;  %v471_v35 = vpop.f32.mrb[2].mxu1 }
 0x118   :  { %v512_v36 = vpop.f32.mrb[2].mxu0  ;;  %v509_v37 = vadd.f32 %v508_v30, %v468_v31  ;;  %v472_v38 = vpop.f32.mrb[3].mxu1 }
 0x119   :  { %v513_v39 = vpop.f32.mrb[3].mxu0  ;;  %v511_v40 = vadd.f32 %v510_v33, %v470_v34 }
 0x11a   :  { %v515_v41 = vmax.f32 %v509_v37, 0.0 }
 0x11b   :  { %v516_v42 = vmax.f32 %v511_v40, 0.0 }
 0x11c   :  { %v517_v44 = vpack.c.bf16 %v515_v41, %v515_v41 }
 0x11d   :  { %v518_v43 = vpack.c.bf16 %v516_v42, %v516_v42 }
 0x11f   :  { %686 = vmatprep.mubr.bf16.mxu1 %v518_v43 }
 0x120   :  { %687 = vmatmul.mubr.bf16.vlgmr.msra.gmra.mrb[4].mxu1 %v517_v44 }
 0x1f3   :  { %v800_v45 = vpop.f32.mrb[4].mxu1 }
 0x1f4   :  { %v801_v47 = vpop.f32.mrb[5].mxu1 }
 0x1f5   :  { %v802_v48 = vadd.f32 %v801_v47, %v800_v45  ;;  %v803_v49 = vpop.f32.mrb[6].mxu1 }
 0x1f6   :  { %v804_v50 = vpop.f32.mrb[7].mxu1 }
 0x1f7   :  { %v689_v51 = vadd.f32 %v802_v48, %v767_v46 }
 0x1f9   :  { %694 = vst [vmem:[%s1216_s5] sm:$0xff] %v689_v51 }

</bundles_post_ra>
